<compile_context>
chip_gen: v7x
topology: tpu7x:2x2x1
jax: 0.10.0
libtpu: 0.0.40
codegen_flags: <defaults>
</compile_context>

<pallas_src>
import functools

import jax
import jax.numpy as jnp
from jax.experimental import pallas as pl
from jax.experimental.pallas import tpu as pltpu


def _d2s_slab_kernel(x_ref, o_ref):
    # Slab path: both refs are (ht, W, rcs); the DMA already did the slicing.
    o_ref[...] = x_ref[...]


def _d2s_slice_kernel(r, rcs, x_ref, o_ref):
    # Generic path: x_ref (ht, W, C), o_ref (ht, r, W, rcs).
    # Static Ref slices only — no full-tile value kept live across the loop.
    for i in range(r):
        o_ref[:, i, :, :] = x_ref[:, :, i * rcs:(i + 1) * rcs]


def _cdiv(a, b):
    return -(-a // b)


def _round_up(x, m):
    return _cdiv(x, m) * m


def _vmem_capacity_bytes():
    try:
        info = pltpu.get_tpu_info()
        cap = getattr(info, "vmem_capacity_bytes", None)
        if cap:
            return int(cap)
    except Exception:
        pass
    return 64 * 1024 * 1024          # conservative fallback (v7x per-core VMEM)


def _vmem_budgets():
    cap = _vmem_capacity_bytes()
    # Scoped limit: 96 MiB on 128-MiB parts (v5e/v6e), 48 MiB on v7x (64 MiB).
    vmem_limit = min((cap * 3) // 4, 96 * 1024 * 1024)
    # Budget for the double-buffered in+out blocks, leaving compiler headroom.
    block_budget = (vmem_limit * 2) // 3
    return vmem_limit, block_budget


def _pick_h_tile(N, H, W, C, rcs, itemsize, slab_path, block_budget,
                 target_steps=8):
    """Largest ht whose double-buffered blocks fit; capped for grid parallelism."""
    r = C // rcs
    sub = max(8, 32 // itemsize)     # sublane packing: 8 (f32) / 16 (bf16) / 32 (i8)
    lane = 128
    if slab_path:
        # in block (ht, W, rcs) + out block (ht, W, rcs)
        per_h = 2 * _round_up(W, sub) * _round_up(rcs, lane) * itemsize
    else:
        # in block (ht, W, C) + out block (ht, r, W, rcs)
        per_h = (_round_up(W, sub) * _round_up(C, lane)
                 + r * _round_up(W, sub) * _round_up(rcs, lane)) * itemsize
    per_h *= 2                       # default double buffering
    ht = max(1, min(H, block_budget // per_h))
    # Guarantee >= target_steps grid steps: pipelining + both v7x TensorCores.
    extra = r if slab_path else 1
    needed_h_blocks = _cdiv(target_steps, max(1, N * extra))
    if needed_h_blocks > 1:
        ht = min(ht, max(1, H // needed_h_blocks))
    return ht


def _d2s_nhwc_view(x_nhwc, r, cs):
    """Kernel call: NHWC (N,H,W,C) -> (N, H, r, W, r*cs) view of the output."""
    N, H, W, C = x_nhwc.shape
    rcs = r * cs
    itemsize = jnp.dtype(x_nhwc.dtype).itemsize
    vmem_limit, block_budget = _vmem_budgets()

    # Slab path: DMA-side channel slicing.  Needs lane-aligned slabs (last block
    # dim must be a multiple of 128) and >= ~512 B strided-read bursts.
    slab_path = (rcs % 128 == 0) and (rcs * itemsize >= 512)

    ht = _pick_h_tile(N, H, W, C, rcs, itemsize, slab_path, block_budget)
    hb = _cdiv(H, ht)                # ragged last H block is masked by Pallas
    out_shape = jax.ShapeDtypeStruct((N, H, r, W, rcs), x_nhwc.dtype)

    if slab_path:
        call = pl.pallas_call(
            _d2s_slab_kernel,
            out_shape=out_shape,
            grid_spec=pltpu.PrefetchScalarGridSpec(
                num_scalar_prefetch=0,
                grid=(N, hb, r),
                in_specs=[
                    pl.BlockSpec((None, ht, W, rcs),
                                 lambda n, h, i: (n, h, 0, i)),
                ],
                out_specs=pl.BlockSpec((None, ht, None, W, rcs),
                                       lambda n, h, i: (n, h, i, 0, 0)),
            ),
            compiler_params=pltpu.CompilerParams(
                dimension_semantics=("parallel", "parallel", "parallel"),
                vmem_limit_bytes=vmem_limit,
            ),
        )
    else:
        call = pl.pallas_call(
            functools.partial(_d2s_slice_kernel, r, rcs),
            out_shape=out_shape,
            grid_spec=pltpu.PrefetchScalarGridSpec(
                num_scalar_prefetch=0,
                grid=(N, hb),
                in_specs=[
                    pl.BlockSpec((None, ht, W, C), lambda n, h: (n, h, 0, 0)),
                ],
                out_specs=pl.BlockSpec((None, ht, r, W, rcs),
                                       lambda n, h: (n, h, 0, 0, 0)),
            ),
            compiler_params=pltpu.CompilerParams(
                dimension_semantics=("parallel", "parallel"),
                vmem_limit_bytes=vmem_limit,
            ),
        )
    return call(x_nhwc)


def depth_to_space_nhwc(x_nhwc, block_size):
    """Zero-transpose NHWC entry point: (N,H,W,C) -> (N, H*r, W*r, C // r**2)."""
    r = int(block_size)
    N, H, W, C = x_nhwc.shape
    if r == 1:
        return x_nhwc
    assert C % (r * r) == 0, "channels must be divisible by block_size**2"
    cs = C // (r * r)
    out_view = _d2s_nhwc_view(x_nhwc, r, cs)          # (N, H, r, W, r*cs)
    return out_view.reshape(N, H * r, W * r, cs)      # free row-major view


def depth_to_space(x_nchw, block_size):
    """PyTorch-equivalent DepthToSpace.forward: NCHW -> NCHW."""
    r = int(block_size)
    N, C, H, W = x_nchw.shape
    if r == 1:
        return x_nchw
    # TODO(synk): these two permutes are separate, un-fusable XLA transposes and
    # roughly triple end-to-end HBM traffic; keep the surrounding model NHWC
    # (depth_to_space_nhwc) to avoid them.  Folding NCHW directly into the
    # kernel needs a stride-r lane interleave along W with no reliably
    # supported Mosaic lowering, so it is not attempted here.
    x_nhwc = jnp.transpose(x_nchw, (0, 2, 3, 1))
    out_nhwc = depth_to_space_nhwc(x_nhwc, r)
    return jnp.transpose(out_nhwc, (0, 3, 1, 2))


def depth_to_space_ref(x_nchw, block_size):
    """Pure-JAX reference matching the PyTorch module (DCR ordering)."""
    r = int(block_size)
    N, C, H, W = x_nchw.shape
    cs = C // (r * r)
    t = x_nchw.reshape(N, r, r, cs, H, W)             # (n, i, j, s, h, w)
    t = jnp.transpose(t, (0, 3, 4, 1, 5, 2))          # (n, s, h, i, w, j)
    return t.reshape(N, cs, H * r, W * r)


if __name__ == "__main__":
    key = jax.random.PRNGKey(0)
    cases = [
        ((2, 8, 16, 16), 2),    # generic path, tiled H       (grid (2, 4))
        ((1, 16, 8, 8), 4),     # generic path, ht == 1       (grid (1, 8))
        ((3, 8, 10, 16), 2),    # generic path, ragged H      (grid (3, 4), ht=3)
        ((1, 256, 8, 8), 2),    # slab path, rcs = 128        (grid (1, 4, 2))
    ]
    for shape, r in cases:
        key, sub = jax.random.split(key)
        x = jax.random.normal(sub, shape, jnp.float32)

        out = depth_to_space(x, r)
        jax.block_until_ready(out)
        ref = depth_to_space_ref(x, r)
        N, C, H, W = shape
        assert out.shape == (N, C // (r * r), H * r, W * r)
        assert jnp.array_equal(out, ref), f"NCHW mismatch for {shape}, r={r}"

        # NHWC fast path (no wrapper transposes) must match as well.
        out_nhwc = depth_to_space_nhwc(jnp.transpose(x, (0, 2, 3, 1)), r)
        jax.block_until_ready(out_nhwc)
        assert jnp.array_equal(jnp.transpose(out_nhwc, (0, 3, 1, 2)), ref), \
            f"NHWC mismatch for {shape}, r={r}"

    print("KERNEL_OK")
</pallas_src>

<mosaic_0001>
module attributes {stable_mosaic.version = 11 : i64} {
  func.func @_d2s_slice_kernel(%arg0: i32, %arg1: i32, %arg2: memref<1x4x16x8xf32, #tpu.memory_space<vmem>>, %arg3: memref<1x4x2x16x4xf32, #tpu.memory_space<vmem>>) attributes {dimension_semantics = [#tpu.dimension_semantics<parallel>, #tpu.dimension_semantics<parallel>], iteration_bounds = array<i64: 2, 4>, scalar_prefetch = 0 : i64, scratch_operands = 0 : i64, tpu.core_type = #tpu.core_type<tc>, window_params = [{transform_indices = @transform_0, window_bounds = array<i64: 1, 4, 16, 8>}, {transform_indices = @transform_1, window_bounds = array<i64: 1, 4, 2, 16, 4>}]} {
    %c0 = arith.constant 0 : index
    %c0_0 = arith.constant 0 : index
    %c0_1 = arith.constant 0 : index
    %c0_2 = arith.constant 0 : index
    %0 = vector.load %arg2[%c0, %c0_0, %c0_1, %c0_2] : memref<1x4x16x8xf32, #tpu.memory_space<vmem>>, vector<1x4x16x4xf32>
    %1 = vector.shape_cast %0 : vector<1x4x16x4xf32> to vector<4x16x4xf32>
    %c0_3 = arith.constant 0 : index
    %c0_4 = arith.constant 0 : index
    %c0_5 = arith.constant 0 : index
    %c0_6 = arith.constant 0 : index
    %c0_7 = arith.constant 0 : index
    %2 = vector.load %arg3[%c0_3, %c0_4, %c0_5, %c0_6, %c0_7] : memref<1x4x2x16x4xf32, #tpu.memory_space<vmem>>, vector<1x4x1x16x4xf32>
    %3 = vector.shape_cast %2 : vector<1x4x1x16x4xf32> to vector<4x16x4xf32>
    %4 = vector.shape_cast %1 : vector<4x16x4xf32> to vector<1x4x1x16x4xf32>
    tpu.vector_store %arg3[%c0_3, %c0_4, %c0_5, %c0_6, %c0_7], %4 {strides = array<i32>} : memref<1x4x2x16x4xf32, #tpu.memory_space<vmem>>, vector<1x4x1x16x4xf32>,
    %c0_8 = arith.constant 0 : index
    %c0_9 = arith.constant 0 : index
    %c0_10 = arith.constant 0 : index
    %c4 = arith.constant 4 : index
    %5 = vector.load %arg2[%c0_8, %c0_9, %c0_10, %c4] : memref<1x4x16x8xf32, #tpu.memory_space<vmem>>, vector<1x4x16x4xf32>
    %6 = vector.shape_cast %5 : vector<1x4x16x4xf32> to vector<4x16x4xf32>
    %c0_11 = arith.constant 0 : index
    %c0_12 = arith.constant 0 : index
    %c1 = arith.constant 1 : index
    %c0_13 = arith.constant 0 : index
    %c0_14 = arith.constant 0 : index
    %7 = vector.load %arg3[%c0_11, %c0_12, %c1, %c0_13, %c0_14] : memref<1x4x2x16x4xf32, #tpu.memory_space<vmem>>, vector<1x4x1x16x4xf32>
    %8 = vector.shape_cast %7 : vector<1x4x1x16x4xf32> to vector<4x16x4xf32>
    %9 = vector.shape_cast %6 : vector<4x16x4xf32> to vector<1x4x1x16x4xf32>
    tpu.vector_store %arg3[%c0_11, %c0_12, %c1, %c0_13, %c0_14], %9 {strides = array<i32>} : memref<1x4x2x16x4xf32, #tpu.memory_space<vmem>>, vector<1x4x1x16x4xf32>,
    return
  }
  func.func @transform_0(%arg0: i32, %arg1: i32) -> (i32, i32, i32, i32) {
    %c0_i32 = arith.constant 0 : i32
    %c0_i32_0 = arith.constant 0 : i32
    %c0_i32_1 = arith.constant 0 : i32
    return %arg0, %arg1, %c0_i32, %c0_i32_0 : i32, i32, i32, i32
  }
  func.func @transform_1(%arg0: i32, %arg1: i32) -> (i32, i32, i32, i32, i32) {
    %c0_i32 = arith.constant 0 : i32
    %c0_i32_0 = arith.constant 0 : i32
    %c0_i32_1 = arith.constant 0 : i32
    %c0_i32_2 = arith.constant 0 : i32
    return %arg0, %arg1, %c0_i32, %c0_i32_0, %c0_i32_1 : i32, i32, i32, i32, i32
  }
}

</mosaic_0001>

<bundles_post_ra>
// kernel: tpu_custom_call.1
= control target key start
LH: loop header
LB: loop body
LE: loop exit
PB: predicated region body
PF: predicated region fallthrough
CT: control target
= control target key end

     0   :  { %s441_s6 = smov 0   ;;  %s443_s7 = smov 0   ;;  %s526_s0 = inlined_call_operand.vmem [shape: f32[2,16,16,8], index: 0, kind: input, shape index: {}]   ;;  %s527_s1 = inlined_call_operand.vmem [shape: f32[2,16,2,16,4], index: 1, kind: output, shape index: {}]  }
   0x1   :  { %s445_s8 = smov 0   ;;  %s447_s9 = smov 0  }
   0x2   :  { %s449_s10 = smov 0  }
   0x3 LB: > { %s20_s11 = sadd.s32 1, %s420_s8  ;;  %s23_s12 = sadd.s32 1, %s424_s9  ;;  %s428_s10 = sphi %s449_s10, %s11_s10   ;;  %s424_s9 = sphi %s447_s9, %s531_s9   ;;  %s420_s8 = sphi %s445_s8, %s530_s8   ;;  %s416_s7 = sphi %s443_s7, %s529_s7   ;;  %s412_s6 = sphi %s441_s6, %s528_s6  }
   0x4   : > { %p21_p0 = scmp.ge.s32.totalorder %s20_s11, 4  ;;  %p330_p1 = scmp.ge.s32.totalorder %s428_s10, 1 }
   0x5   : > { %p109_p2 = scmp.lt.s32.totalorder %s428_s10, 9 }
   0x6   : > { %s533_s11 = smov (%p21_p0, %s20_s11), 0  ;;  %s535_s12 = smov (!%p21_p0, %s23_s12), %s424_s9 }
   0x7   : > { %p110_p3 = pnand %p330_p1, %p109_p2  ;;  %p25_p4 = scmp.ge.s32.totalorder %s535_s12, 2 }
   0x8   : > { %s331_s13 = sshll.u32 (!%p110_p3), %s412_s6, 2  ;;  %p140_p5 = scmp.lt.s32.totalorder (!%p110_p3), %s416_s7, 1  ;;  %vm169_vm0 = vcmask (!%p110_p3), 31744  }
   0x9   : > { %s537_s12 = smov (%p25_p4, %s535_s12), 0  ;;  %113 = sbr.rel (%p110_p3) target bundleno = 153 (0x99), region = 24 }
   0xa   : > { %p142_p6 = scmp.lt.s32.totalorder (!%p110_p3), %s331_s13, 15  ;;  %s430_s28 = smov (!%p110_p3), 124  }
  0x10   : > { %s539_s7 = smov (!%p140_p5, %s416_s7), 1  ;;  %s541_s13 = smov (!%p142_p6, %s331_s13), 15 }
  0x11   : > { %s333_s14 = sshll.u32 %s539_s7, 5  ;;  %s337_s15 = sshll.u32 %s539_s7, 6 }
  0x12   : > { %s332_s16 = sshll.u32 %s541_s13, 1  ;;  %s336_s17 = sshll.u32 %s541_s13, 2 }
  0x13   : > { %s146_s18 = sadd.s32 %s333_s14, %s332_s16  ;;  %s157_s19 = sadd.s32 %s337_s15, %s336_s17 }
  0x14   : > { %s334_s20 = sshll.u32 %s146_s18, 3  ;;  %s338_s21 = sshll.u32 %s157_s19, 3 }
  0x15   : > { %s148_s24 = scalar_lea.vmem %s526_s0, %s334_s20  ;;  %s477_s27 = scalar_lea.vmem %s527_s1, %s338_s21 }
  0x16   : > { %v180_v0 = vld [vmem:[%s148_s24 + $0x10] sm:$0xff]  ;;  %v161_v1 = vld [vmem:[%s148_s24] sm:$0xff]  ;;  %v162_v2 = vld [vmem:[%s148_s24 + $0x8] sm:$0xff] }
  0x17   : > { %198 = vrot.lane.b32.xlu1 %v180_v0, %s430_s28  ;;  %v164_v3 = vld [vmem:[%s148_s24 + $0x18] sm:$0xff]  ;;  %v165_v4 = vld [vmem:[%s148_s24 + $0x20] sm:$0xff]  ;;  %v166_v5 = vld [vmem:[%s148_s24 + $0x28] sm:$0xff] }
  0x18   : > { %170 = vst.msk [vmem:[%s477_s27] sm:$0xff] %vm169_vm0, %v161_v1  ;;  %171 = vst.msk [vmem:[%s477_s27 + $0x8] sm:$0xff] %vm169_vm0, %v162_v2  ;;  %v167_v6 = vld [vmem:[%s148_s24 + $0x30] sm:$0xff]  ;;  %v168_v7 = vld [vmem:[%s148_s24 + $0x38] sm:$0xff] }
  0x19   : > { %172 = vst.msk [vmem:[%s477_s27 + $0x20] sm:$0xff] %vm169_vm0, %v180_v0  ;;  %194 = vrot.lane.b32.xlu0 %v161_v1, %s430_s28  ;;  %173 = vst.msk [vmem:[%s477_s27 + $0x28] sm:$0xff] %vm169_vm0, %v164_v3 }
  0x1a   : > { %174 = vst.msk [vmem:[%s477_s27 + $0x40] sm:$0xff] %vm169_vm0, %v165_v4  ;;  %175 = vst.msk [vmem:[%s477_s27 + $0x48] sm:$0xff] %vm169_vm0, %v166_v5 }
  0x1b   : > { %176 = vst.msk [vmem:[%s477_s27 + $0x60] sm:$0xff] %vm169_vm0, %v167_v6  ;;  %177 = vst.msk [vmem:[%s477_s27 + $0x68] sm:$0xff] %vm169_vm0, %v168_v7  ;;  %200 = vrot.lane.b32.xlu1 %v164_v3, %s430_s28 }
  0x1d   : > { %196 = vrot.lane.b32.xlu0 %v162_v2, %s430_s28 }
  0x1f   : > { %204 = vrot.lane.b32.xlu1 %v166_v5, %s430_s28 }
  0x21   : > { %202 = vrot.lane.b32.xlu0 %v165_v4, %s430_s28 }
  0x23   : > { %208 = vrot.lane.b32.xlu1 %v168_v7, %s430_s28 }
  0x25   : > { %206 = vrot.lane.b32.xlu0 %v167_v6, %s430_s28 }
  0x89   : > { %v199_v8 = vpop.permute.xlu1 %198 }
  0x8a   : > { %341 = vst.msk [vmem:[%s477_s27 + $0x30] sm:$0xff] %vm169_vm0, %v199_v8 }
  0x8b   : > { %v195_v9 = vpop.permute.xlu0 %194 }
  0x8c   : > { %339 = vst.msk [vmem:[%s477_s27 + $0x10] sm:$0xff] %vm169_vm0, %v195_v9 }
  0x8d   : > { %v201_v10 = vpop.permute.xlu1 %200 }
  0x8e   : > { %342 = vst.msk [vmem:[%s477_s27 + $0x38] sm:$0xff] %vm169_vm0, %v201_v10 }
  0x8f   : > { %v197_v11 = vpop.permute.xlu0 %196 }
  0x90   : > { %340 = vst.msk [vmem:[%s477_s27 + $0x18] sm:$0xff] %vm169_vm0, %v197_v11 }
  0x91   : > { %v205_v12 = vpop.permute.xlu1 %204 }
  0x92   : > { %344 = vst.msk [vmem:[%s477_s27 + $0x58] sm:$0xff] %vm169_vm0, %v205_v12 }
  0x93   : > { %v203_v13 = vpop.permute.xlu0 %202 }
  0x94   : > { %343 = vst.msk [vmem:[%s477_s27 + $0x50] sm:$0xff] %vm169_vm0, %v203_v13 }
  0x95   : > { %v209_v14 = vpop.permute.xlu1 %208 }
  0x96   : > { %346 = vst.msk [vmem:[%s477_s27 + $0x78] sm:$0xff] %vm169_vm0, %v209_v14 }
  0x97   : > { %v207_v15 = vpop.permute.xlu0 %206 }
  0x98   : > { %345 = vst.msk [vmem:[%s477_s27 + $0x70] sm:$0xff] %vm169_vm0, %v207_v15 }
  0x99 PF: > { %s11_s10 = sadd.s32 1, %s428_s10   ;;  %s528_s6 = smov %s420_s8 }
  0x9a   : > { %p8_p7 = scmp.ge.s32.totalorder %s11_s10, 10   ;;  %s529_s7 = smov %s424_s9 }
  0x9b   : > { %s530_s8 = smov %s533_s11  ;;  %s531_s9 = smov %s537_s12 }
  0x9c   :  { %10 = sbr.rel (!%p8_p7) target bundleno = 3 (0x3), region = 55 }

</bundles_post_ra>
